<compile_context>
chip_gen: v7x
topology: tpu7x:2x2x1
jax: 0.10.0
libtpu: 0.0.40
codegen_flags: <defaults>
</compile_context>

<pallas_src>
import jax
import jax.numpy as jnp
import numpy as np
from jax.experimental import pallas as pl
from jax.experimental.pallas import tpu as pltpu


def _round_up(x, m):
    return ((x + m - 1) // m) * m


def _relation_mlp_kernel(xl_ref, xr_ref, xg_ref,
                         w1l_ref, w1r_ref, w1g_ref, b1_ref,
                         w2_ref, b2_ref, o_ref):
    # One batch tile of one relation:
    #   h = tanh(cat(xl, xr, xg) @ W1 + b1)      (split-weight form, no concat)
    #   o = h @ W2 + b2
    h = jnp.dot(xl_ref[...], w1l_ref[...], preferred_element_type=jnp.float32)
    h = h + jnp.dot(xr_ref[...], w1r_ref[...], preferred_element_type=jnp.float32)
    h = h + jnp.dot(xg_ref[...], w1g_ref[...], preferred_element_type=jnp.float32)
    h = jnp.tanh(h + b1_ref[...])
    o = jnp.dot(h, w2_ref[...], preferred_element_type=jnp.float32) + b2_ref[...]
    o_ref[...] = o.astype(o_ref.dtype)


def adaptive_relational_prior_forward(add_left, add_right, add_rel,
                                      sub_left, sub_right, sub_rel,
                                      mul_left, mul_right, mul_rel,
                                      params, *, block_b=512):
    """Pallas equivalent of AdaptiveRelationalPrior.forward.

    Returns (z_add_pred, z_sub_pred, z_mul_pred), each (batch, z_dim) float32.
    params: dict with w1 (3*z_dim, H), b1 (H,), w2 (H, z_dim), b2 (z_dim,).
    """
    w1, b1, w2, b2 = params["w1"], params["b1"], params["w2"], params["b2"]
    b, z = add_left.shape
    h = w1.shape[1]
    d_out = w2.shape[1]

    # Stack the three relations on a leading axis -> (3, B, z_dim) per operand.
    xl = jnp.stack([add_left, sub_left, mul_left], axis=0).astype(jnp.float32)
    xr = jnp.stack([add_right, sub_right, mul_right], axis=0).astype(jnp.float32)
    xg = jnp.stack([add_rel, sub_rel, mul_rel], axis=0).astype(jnp.float32)

    # Pad batch rows to the tile size (sublane multiple).
    tb = min(block_b, _round_up(b, 8))
    b_pad = _round_up(b, tb)
    if b_pad != b:
        pad = ((0, 0), (0, b_pad - b), (0, 0))
        xl, xr, xg = jnp.pad(xl, pad), jnp.pad(xr, pad), jnp.pad(xg, pad)

    # Split W1 into the three row blocks the torch.cat would have hit.
    w1l, w1r, w1g = w1[:z], w1[z:2 * z], w1[2 * z:]

    # Lane-dense output: pad the output feature dim to a multiple of 128.
    d_pad = _round_up(d_out, 128)
    w2p = jnp.pad(w2, ((0, 0), (0, d_pad - d_out)))
    b2p = jnp.pad(b2, (0, d_pad - d_out)).reshape(1, d_pad)
    b1r = b1.reshape(1, h)

    grid = (3, b_pad // tb)
    x_spec = pl.BlockSpec((None, tb, z), lambda r, i: (r, i, 0))
    w1_spec = pl.BlockSpec((z, h), lambda r, i: (0, 0))

    # Compat guard: older jax spells this TPUCompilerParams.
    _cp = getattr(pltpu, "CompilerParams", None) or getattr(pltpu, "TPUCompilerParams", None)
    compiler_params = _cp(dimension_semantics=("parallel", "parallel")) if _cp else None

    out = pl.pallas_call(
        _relation_mlp_kernel,
        out_shape=jax.ShapeDtypeStruct((3, b_pad, d_pad), jnp.float32),
        grid=grid,
        in_specs=[x_spec, x_spec, x_spec,
                  w1_spec, w1_spec, w1_spec,
                  pl.BlockSpec((1, h), lambda r, i: (0, 0)),
                  pl.BlockSpec((h, d_pad), lambda r, i: (0, 0)),
                  pl.BlockSpec((1, d_pad), lambda r, i: (0, 0))],
        out_specs=pl.BlockSpec((None, tb, d_pad), lambda r, i: (r, i, 0)),
        compiler_params=compiler_params,
    )(xl, xr, xg, w1l, w1r, w1g, b1r, w2p, b2p)

    out = out[:, :b, :d_out]
    return out[0], out[1], out[2]


if __name__ == "__main__":
    key = jax.random.PRNGKey(0)
    z_dim = 16      # cfg.model.z_dim (small example)
    hidden = 1024   # relation_layer hidden width from the spec
    batch = 8

    ks = jax.random.split(key, 11)

    def rnd(k, shape, scale=1.0):
        return scale * jax.random.normal(k, shape, dtype=jnp.float32)

    # batch.{add,sub,mul}_{left_sample, right_sample, relation} -> (batch, z_dim)
    add_l, add_r, add_g = rnd(ks[0], (batch, z_dim)), rnd(ks[1], (batch, z_dim)), rnd(ks[2], (batch, z_dim))
    sub_l, sub_r, sub_g = rnd(ks[3], (batch, z_dim)), rnd(ks[4], (batch, z_dim)), rnd(ks[5], (batch, z_dim))
    mul_l, mul_r, mul_g = rnd(ks[6], (batch, z_dim)), rnd(ks[7], (batch, z_dim)), rnd(ks[8], (batch, z_dim))

    params = {
        "w1": rnd(ks[9], (3 * z_dim, hidden), scale=(1.0 / (3 * z_dim)) ** 0.5),
        "b1": jnp.zeros((hidden,), jnp.float32),
        "w2": rnd(ks[10], (hidden, z_dim), scale=(1.0 / hidden) ** 0.5),
        "b2": jnp.zeros((z_dim,), jnp.float32),
    }

    z_add, z_sub, z_mul = adaptive_relational_prior_forward(
        add_l, add_r, add_g, sub_l, sub_r, sub_g, mul_l, mul_r, mul_g, params)
    jax.block_until_ready((z_add, z_sub, z_mul))

    # Pure-JAX reference of the same forward (concat + tanh MLP).
    def ref(l, r, g):
        x = jnp.concatenate([l, r, g], axis=-1)
        hh = jnp.tanh(x @ params["w1"] + params["b1"])
        return hh @ params["w2"] + params["b2"]

    np.testing.assert_allclose(np.asarray(z_add), np.asarray(ref(add_l, add_r, add_g)), rtol=5e-2, atol=5e-2)
    np.testing.assert_allclose(np.asarray(z_sub), np.asarray(ref(sub_l, sub_r, sub_g)), rtol=5e-2, atol=5e-2)
    np.testing.assert_allclose(np.asarray(z_mul), np.asarray(ref(mul_l, mul_r, mul_g)), rtol=5e-2, atol=5e-2)

    assert z_add.shape == (batch, z_dim) and z_add.dtype == jnp.float32
    assert z_sub.shape == (batch, z_dim) and z_mul.shape == (batch, z_dim)
    assert bool(jnp.all(jnp.isfinite(z_add))) and bool(jnp.all(jnp.isfinite(z_sub))) and bool(jnp.all(jnp.isfinite(z_mul)))

    print("KERNEL_OK")
</pallas_src>

<mosaic_0001>
module attributes {stable_mosaic.version = 11 : i64} {
  func.func @_relation_mlp_kernel(%arg0: i32, %arg1: i32, %arg2: memref<1x8x16xf32, #tpu.memory_space<vmem>>, %arg3: memref<1x8x16xf32, #tpu.memory_space<vmem>>, %arg4: memref<1x8x16xf32, #tpu.memory_space<vmem>>, %arg5: memref<16x1024xf32, #tpu.memory_space<vmem>>, %arg6: memref<16x1024xf32, #tpu.memory_space<vmem>>, %arg7: memref<16x1024xf32, #tpu.memory_space<vmem>>, %arg8: memref<1x1024xf32, #tpu.memory_space<vmem>>, %arg9: memref<1024x128xf32, #tpu.memory_space<vmem>>, %arg10: memref<1x128xf32, #tpu.memory_space<vmem>>, %arg11: memref<1x8x128xf32, #tpu.memory_space<vmem>>) attributes {dimension_semantics = [#tpu.dimension_semantics<parallel>, #tpu.dimension_semantics<parallel>], iteration_bounds = array<i64: 3, 1>, scalar_prefetch = 0 : i64, scratch_operands = 0 : i64, tpu.core_type = #tpu.core_type<tc>, window_params = [{transform_indices = @transform_0, window_bounds = array<i64: 1, 8, 16>}, {transform_indices = @transform_1, window_bounds = array<i64: 1, 8, 16>}, {transform_indices = @transform_2, window_bounds = array<i64: 1, 8, 16>}, {pipeline_mode = #tpu.pipeline_mode<synchronous>, transform_indices = @transform_3, window_bounds = array<i64: 16, 1024>}, {pipeline_mode = #tpu.pipeline_mode<synchronous>, transform_indices = @transform_4, window_bounds = array<i64: 16, 1024>}, {pipeline_mode = #tpu.pipeline_mode<synchronous>, transform_indices = @transform_5, window_bounds = array<i64: 16, 1024>}, {pipeline_mode = #tpu.pipeline_mode<synchronous>, transform_indices = @transform_6, window_bounds = array<i64: 1, 1024>}, {pipeline_mode = #tpu.pipeline_mode<synchronous>, transform_indices = @transform_7, window_bounds = array<i64: 1024, 128>}, {pipeline_mode = #tpu.pipeline_mode<synchronous>, transform_indices = @transform_8, window_bounds = array<i64: 1, 128>}, {transform_indices = @transform_9, window_bounds = array<i64: 1, 8, 128>}]} {
    %c0 = arith.constant 0 : index
    %c0_0 = arith.constant 0 : index
    %c0_1 = arith.constant 0 : index
    %0 = vector.load %arg2[%c0, %c0_0, %c0_1] : memref<1x8x16xf32, #tpu.memory_space<vmem>>, vector<1x8x16xf32>
    %1 = vector.shape_cast %0 : vector<1x8x16xf32> to vector<8x16xf32>
    %c0_2 = arith.constant 0 : index
    %c0_3 = arith.constant 0 : index
    %2 = vector.load %arg5[%c0_2, %c0_3] : memref<16x1024xf32, #tpu.memory_space<vmem>>, vector<16x1024xf32>
    %cst = arith.constant dense<0.000000e+00> : vector<8x1024xf32>
    %3 = tpu.matmul %1, %2, %cst {dimension_numbers = #tpu.dot_dimension_numbers<[1], [0], [0], [1], [0, 0, 1, 1], [], []>} : vector<8x16xf32>, vector<16x1024xf32>, vector<8x1024xf32> -> vector<8x1024xf32>
    %c0_4 = arith.constant 0 : index
    %c0_5 = arith.constant 0 : index
    %c0_6 = arith.constant 0 : index
    %4 = vector.load %arg3[%c0_4, %c0_5, %c0_6] : memref<1x8x16xf32, #tpu.memory_space<vmem>>, vector<1x8x16xf32>
    %5 = vector.shape_cast %4 : vector<1x8x16xf32> to vector<8x16xf32>
    %c0_7 = arith.constant 0 : index
    %c0_8 = arith.constant 0 : index
    %6 = vector.load %arg6[%c0_7, %c0_8] : memref<16x1024xf32, #tpu.memory_space<vmem>>, vector<16x1024xf32>
    %cst_9 = arith.constant dense<0.000000e+00> : vector<8x1024xf32>
    %7 = tpu.matmul %5, %6, %cst_9 {dimension_numbers = #tpu.dot_dimension_numbers<[1], [0], [0], [1], [0, 0, 1, 1], [], []>} : vector<8x16xf32>, vector<16x1024xf32>, vector<8x1024xf32> -> vector<8x1024xf32>
    %8 = arith.addf %3, %7 : vector<8x1024xf32>
    %c0_10 = arith.constant 0 : index
    %c0_11 = arith.constant 0 : index
    %c0_12 = arith.constant 0 : index
    %9 = vector.load %arg4[%c0_10, %c0_11, %c0_12] : memref<1x8x16xf32, #tpu.memory_space<vmem>>, vector<1x8x16xf32>
    %10 = vector.shape_cast %9 : vector<1x8x16xf32> to vector<8x16xf32>
    %c0_13 = arith.constant 0 : index
    %c0_14 = arith.constant 0 : index
    %11 = vector.load %arg7[%c0_13, %c0_14] : memref<16x1024xf32, #tpu.memory_space<vmem>>, vector<16x1024xf32>
    %cst_15 = arith.constant dense<0.000000e+00> : vector<8x1024xf32>
    %12 = tpu.matmul %10, %11, %cst_15 {dimension_numbers = #tpu.dot_dimension_numbers<[1], [0], [0], [1], [0, 0, 1, 1], [], []>} : vector<8x16xf32>, vector<16x1024xf32>, vector<8x1024xf32> -> vector<8x1024xf32>
    %13 = arith.addf %8, %12 : vector<8x1024xf32>
    %c0_16 = arith.constant 0 : index
    %c0_17 = arith.constant 0 : index
    %14 = vector.load %arg8[%c0_16, %c0_17] : memref<1x1024xf32, #tpu.memory_space<vmem>>, vector<1x1024xf32>
    %15 = vector.broadcast %14 : vector<1x1024xf32> to vector<8x1024xf32>
    %16 = arith.addf %13, %15 : vector<8x1024xf32>
    %17 = math.tanh %16 : vector<8x1024xf32>
    %c0_18 = arith.constant 0 : index
    %c0_19 = arith.constant 0 : index
    %18 = vector.load %arg9[%c0_18, %c0_19] : memref<1024x128xf32, #tpu.memory_space<vmem>>, vector<1024x128xf32>
    %cst_20 = arith.constant dense<0.000000e+00> : vector<8x128xf32>
    %19 = tpu.matmul %17, %18, %cst_20 {dimension_numbers = #tpu.dot_dimension_numbers<[1], [0], [0], [1], [0, 0, 1, 1], [], []>} : vector<8x1024xf32>, vector<1024x128xf32>, vector<8x128xf32> -> vector<8x128xf32>
    %c0_21 = arith.constant 0 : index
    %c0_22 = arith.constant 0 : index
    %20 = vector.load %arg10[%c0_21, %c0_22] : memref<1x128xf32, #tpu.memory_space<vmem>>, vector<1x128xf32>
    %21 = vector.broadcast %20 : vector<1x128xf32> to vector<8x128xf32>
    %22 = arith.addf %19, %21 : vector<8x128xf32>
    %c0_23 = arith.constant 0 : index
    %c0_24 = arith.constant 0 : index
    %c0_25 = arith.constant 0 : index
    %23 = vector.load %arg11[%c0_23, %c0_24, %c0_25] : memref<1x8x128xf32, #tpu.memory_space<vmem>>, vector<1x8x128xf32>
    %24 = vector.shape_cast %23 : vector<1x8x128xf32> to vector<8x128xf32>
    %25 = vector.shape_cast %22 : vector<8x128xf32> to vector<1x8x128xf32>
    tpu.vector_store %arg11[%c0_23, %c0_24, %c0_25], %25 {strides = array<i32>} : memref<1x8x128xf32, #tpu.memory_space<vmem>>, vector<1x8x128xf32>,
    return
  }
  func.func @transform_0(%arg0: i32, %arg1: i32) -> (i32, i32, i32) {
    %c0_i32 = arith.constant 0 : i32
    %c0_i32_0 = arith.constant 0 : i32
    return %arg0, %arg1, %c0_i32 : i32, i32, i32
  }
  func.func @transform_1(%arg0: i32, %arg1: i32) -> (i32, i32, i32) {
    %c0_i32 = arith.constant 0 : i32
    %c0_i32_0 = arith.constant 0 : i32
    return %arg0, %arg1, %c0_i32 : i32, i32, i32
  }
  func.func @transform_2(%arg0: i32, %arg1: i32) -> (i32, i32, i32) {
    %c0_i32 = arith.constant 0 : i32
    %c0_i32_0 = arith.constant 0 : i32
    return %arg0, %arg1, %c0_i32 : i32, i32, i32
  }
  func.func @transform_3(%arg0: i32, %arg1: i32) -> (i32, i32) {
    %c0_i32 = arith.constant 0 : i32
    %c0_i32_0 = arith.constant 0 : i32
    %c0_i32_1 = arith.constant 0 : i32
    return %c0_i32, %c0_i32_0 : i32, i32
  }
  func.func @transform_4(%arg0: i32, %arg1: i32) -> (i32, i32) {
    %c0_i32 = arith.constant 0 : i32
    %c0_i32_0 = arith.constant 0 : i32
    %c0_i32_1 = arith.constant 0 : i32
    return %c0_i32, %c0_i32_0 : i32, i32
  }
  func.func @transform_5(%arg0: i32, %arg1: i32) -> (i32, i32) {
    %c0_i32 = arith.constant 0 : i32
    %c0_i32_0 = arith.constant 0 : i32
    %c0_i32_1 = arith.constant 0 : i32
    return %c0_i32, %c0_i32_0 : i32, i32
  }
  func.func @transform_6(%arg0: i32, %arg1: i32) -> (i32, i32) {
    %c0_i32 = arith.constant 0 : i32
    %c0_i32_0 = arith.constant 0 : i32
    %c0_i32_1 = arith.constant 0 : i32
    return %c0_i32, %c0_i32_0 : i32, i32
  }
  func.func @transform_7(%arg0: i32, %arg1: i32) -> (i32, i32) {
    %c0_i32 = arith.constant 0 : i32
    %c0_i32_0 = arith.constant 0 : i32
    %c0_i32_1 = arith.constant 0 : i32
    return %c0_i32, %c0_i32_0 : i32, i32
  }
  func.func @transform_8(%arg0: i32, %arg1: i32) -> (i32, i32) {
    %c0_i32 = arith.constant 0 : i32
    %c0_i32_0 = arith.constant 0 : i32
    %c0_i32_1 = arith.constant 0 : i32
    return %c0_i32, %c0_i32_0 : i32, i32
  }
  func.func @transform_9(%arg0: i32, %arg1: i32) -> (i32, i32, i32) {
    %c0_i32 = arith.constant 0 : i32
    %c0_i32_0 = arith.constant 0 : i32
    return %arg0, %arg1, %c0_i32 : i32, i32, i32
  }
}

</mosaic_0001>

<bundles_post_ra>
// kernel: tpu_custom_call.1
= control target key start
LH: loop header
LB: loop body
LE: loop exit
PB: predicated region body
PF: predicated region fallthrough
CT: control target
= control target key end

     0   :  { %s3370_s0 = inlined_call_operand.hbm [shape: f32[3,8,16], index: 0, kind: input, shape index: {}]   ;;  %s3371_s1 = inlined_call_operand.hbm [shape: f32[3,8,16], index: 1, kind: input, shape index: {}]   ;;  %s3372_s2 = inlined_call_operand.hbm [shape: f32[3,8,16], index: 2, kind: input, shape index: {}]   ;;  %s3373_s3 = inlined_call_operand.hbm [shape: f32[16,1024], index: 3, kind: input, shape index: {}]   ;;  %s3374_s4 = inlined_call_operand.hbm [shape: f32[16,1024], index: 4, kind: input, shape index: {}]   ;;  %s3375_s5 = inlined_call_operand.hbm [shape: f32[16,1024], index: 5, kind: input, shape index: {}]   ;;  %s3376_s6 = inlined_call_operand.vmem [shape: f32[1,1024], index: 6, kind: input, shape index: {}]   ;;  %s3377_s7 = inlined_call_operand.hbm [shape: f32[1024,128], index: 7, kind: input, shape index: {}]   ;;  %s3378_s8 = inlined_call_operand.vmem [shape: f32[1,128], index: 8, kind: input, shape index: {}]   ;;  %s3379_s9 = inlined_call_operand.hbm [shape: f32[3,8,128], index: 9, kind: output, shape index: {}]  }
   0x1   :  { %3404 = sst [smem:[#allocation27_spill]] %s3371_s1 }
   0x2   :  { %3405 = sst [smem:[#allocation28_spill]] %s3373_s3 }
   0x3   :  { %3406 = sst [smem:[#allocation29_spill]] %s3375_s5 }
   0x4   :  { %3407 = sst [smem:[#allocation30_spill]] %s3378_s8 }
   0x5   :  { %3408 = sst [smem:[#allocation31_spill]] %s3379_s9 }
   0x6   :  { %14 = vsyncpa [#allocation3], 0 }
   0x7   :  { %16 = vsyncpa [#allocation3 + $0x1], 0 }
   0x8   :  { %17 = vsyncpa [#allocation6], 0 }
   0x9   :  { %19 = vsyncpa [#allocation6 + $0x1], 0 }
   0xa   :  { %20 = vsyncpa [#allocation9], 0 }
   0xb   :  { %21 = vsyncpa [#allocation12], 0 }
   0xc   :  { %22 = vsyncpa [#allocation4], 0 }
   0xd   :  { %24 = vsyncpa [#allocation4 + $0x1], 0  ;;  %s2940_s30 = smov 0   ;;  %s2942_s10 = smov 0  }
   0xe   :  { %s2944_s11 = smov 0   ;;  %s2946_s12 = smov 0  }
   0xf   :  { %s2948_s13 = smov 0   ;;  %s2950_s14 = smov 0  }
  0x10 LB: > { %3409 = sst [smem:[#allocation20_spill]] %s2855_s30  ;;  %s2971_s15 = sadd.s32 4294967295, %s2875_s14   ;;  %s2875_s14 = sphi %s2950_s14, %s30_s14   ;;  %s2871_s13 = sphi %s2948_s13, %s3453_s13   ;;  %s2867_s12 = sphi %s2946_s12, %s3452_s12   ;;  %s2863_s11 = sphi %s2944_s11, %s3456_s11   ;;  %s2859_s10 = sphi %s2942_s10, %s3455_s10   ;;  %s2855_s30 = sphi %s2940_s30, %s3454_s30  }
  0x11   : > { %3410 = sst [smem:[#allocation21_spill]] %s2871_s13  ;;  %p2075_p0 = scmp.ge.s32.totalorder %s2875_s14, 1 }
  0x12   : > { %3411 = sst [smem:[#allocation22_spill]] %s2875_s14  ;;  %p3380_p1 = scmp.eq.s32.totalorder %s2971_s15, 0 }
  0x13   : > { %p285_p2 = scmp.lt.s32.totalorder %s2875_s14, 4  ;;  %s2877_s17 = smov [#allocation8]  }
  0x14   : > { %s297_s18 = sshll.u32 %s2877_s17, 4  ;;  %s2878_s20 = smov [#allocation11]   ;;  %s298_s18 = int_to_ptr.vmem [resolvable:$true] %s297_s18 }
  0x15   : > { %p2976_p3 = pnand %p2075_p0, %p285_p2  ;;  %s323_s21 = sshll.u32 %s2878_s20, 4  ;;  %s2988_s21 = int_to_ptr.vmem [resolvable:$true] %s323_s21 }
  0x16   : > { %s3414_s3 = sld [smem:[#allocation28_spill]] }
  0x17   : > { %s3412_s16 = scalar_select %p2976_p3, 1, 0 }
  0x18   : > { %p2469_p4 = pneg %p2976_p3 }
  0x1a   : > { %p2984_p5 = pnand %p2469_p4, %p3380_p1 }
  0x1c   : > { %s3413_s19 = scalar_select %p2984_p5, 1, 0 }
  0x1d   : > { %s2579_s24 = scalar_lea.hbm %s3414_s3, 2048  ;;  %p2998_p7 = pneg %p2984_p5 }
  0x1e   : > { %p2580_p6 = scmp.ne.s32.totalorder %s3414_s3, %s2579_s24  ;;  %p2586_p10 = scmp.lt.u32.totalorder %s2579_s24, %s3414_s3 }
  0x1f   : > { %s3415_s27 = scalar_select %p2998_p7, 1, 0 }
  0x20   : > { %p2582_p8 = pnand %p2998_p7, %p2580_p6 }
  0x22   : > { %p2583_p9 = pneg %p2582_p8 }
  0x24   : > { %p2588_p11 = pnand %p2586_p10, %p2583_p9 }
  0x26   : > { %2591 = shalt.err (!%p2588_p11)
}
  0x27   : > { %s2592_s17 = scalar_lea.vmem %s298_s18, 2048  ;;  %p2600_p2 = scmp.lt.s32.totalorder %s298_s18, %s298_s18 }
  0x28   : > { %p2593_p12 = scmp.ne.s32.totalorder %s298_s18, %s2592_s17  ;;  %p2601_p4 = scmp.lt.s32.totalorder %s2592_s17, %s2592_s17 }
  0x2a   : > { %p2595_p13 = pnand %p2593_p12, %p2998_p7  ;;  %p2602_p1 = por %p2601_p4, %p2600_p2 }
  0x2c   : > { %p2596_p0 = pneg %p2595_p13 }
  0x2e   : > { %p2603_p3 = pnand %p2602_p1, %p2596_p0 }
  0x30   : > { %2606 = shalt.err (!%p2603_p3)
}
  0x31   : > { %s3383_s20 = smov 1024   ;;  %s3384_s22 = smov 64  }
  0x32   : > { %2472 = dma.hbm_to_vmem [thread:$0]  (!%p2984_p5), %s3414_s3, 2048, %s298_s18, [#allocation9], %s3383_s20, %s3383_s20, %s3384_s22  }
  0x33   : > { %s3416_s5 = sld [smem:[#allocation29_spill]] }
  0x39   : > { %s2607_s28 = scalar_lea.hbm %s3416_s5, 2048 }
  0x3a   : > { %p2608_p1 = scmp.ne.s32.totalorder %s3416_s5, %s2607_s28  ;;  %p2614_p8 = scmp.lt.u32.totalorder %s2607_s28, %s3416_s5 }
  0x3c   : > { %p2610_p3 = pnand %p2608_p1, %p2998_p7 }
  0x3e   : > { %p2611_p6 = pneg %p2610_p3 }
  0x40   : > { %p2616_p9 = pnand %p2614_p8, %p2611_p6 }
  0x42   : > { %2619 = shalt.err (!%p2616_p9)
}
  0x43   : > { %s2620_s18 = scalar_lea.vmem %s2988_s21, 2048  ;;  %p2628_p13 = scmp.lt.s32.totalorder %s2988_s21, %s2988_s21 }
  0x44   : > { %p2621_p10 = scmp.ne.s32.totalorder %s2988_s21, %s2620_s18  ;;  %p2629_p0 = scmp.lt.s32.totalorder %s2620_s18, %s2620_s18 }
  0x46   : > { %p2623_p11 = pnand %p2621_p10, %p2998_p7  ;;  %p2630_p2 = por %p2629_p0, %p2628_p13 }
  0x48   : > { %p2624_p12 = pneg %p2623_p11 }
  0x4a   : > { %p2631_p4 = pnand %p2630_p2, %p2624_p12 }
  0x4c   : > { %2634 = shalt.err (!%p2631_p4)
}
  0x4d   : > { %2478 = dma.hbm_to_vmem [thread:$0]  (!%p2984_p5), %s3416_s5, 2048, %s2988_s21, [#allocation12], %s3383_s20, %s3383_s20, %s3384_s22  }
  0x4e   : > { %s2074_s23 = sadd.s32 4294967294, %s2875_s14   ;;  %s42_s24 = sadd.s32 1, %s2871_s13 }
  0x4f   : > { %p44_p1 = scmp.ge.s32.totalorder %s42_s24, 3  ;;  %s51_s25 = sadd.s32 1, %s2863_s11 }
  0x50   : > { %p58_p3 = scmp.ne.s32.totalorder %s2863_s11, %s2859_s10  ;;  %p59_p6 = scmp.eq.s32.totalorder %s2875_s14, 0 }
  0x51   : > { %s3458_s24 = smov (%p44_p1, %s42_s24), 0  ;;  %p64_p9 = scmp.ne.s32.totalorder %s2859_s10, %s2855_s30 }
  0x52   : > { %3417 = sst [smem:[#allocation23_spill]] %s3458_s24  ;;  %p3051_p8 = por %p59_p6, %p58_p3 }
  0x53   : > { %s46_s21 = ssub.s32 %s2871_s13, %s3458_s24  ;;  %p272_p10 = scmp.eq.s32.totalorder %s2971_s15, 2 }
  0x54   : > { %p49_p11 = scmp.eq.s32.totalorder %s46_s21, 0  ;;  %p3419_p12 = scmp.eq.s32.totalorder %s2971_s15, 0 }
  0x55   : > { %p3066_p0 = por %p272_p10, %p58_p3  ;;  %p278_p2 = scmp.eq.s32.totalorder %s2074_s23, 2 }
  0x56   : > { %p3062_p13 = por %p3419_p12, %p64_p9  ;;  %p2500_p1 = scmp.lt.s32.totalorder %s2875_s14, 3 }
  0x57   : > { %s3421_s29 = scalar_select %p3066_p0, 1, 0 }
  0x58   : > { %s3420_s28 = scalar_select %p3062_p13, 1, 0 }
  0x59   : > { %3422 = sst [smem:[#allocation24_spill]] %s3421_s29  ;;  %p3073_p4 = por %p278_p2, %p64_p9 }
  0x5a   : > { %s3071_s17 = scalar_select %p49_p11, %s2863_s11, %s51_s25  }
  0x5b   : > { %s3424_s18 = scalar_select %p3073_p4, 1, 0 }
  0x5c   : > { %3423 = sst [smem:[#allocation25_spill]] %s3071_s17  ;;  %s3385_s8 = sand.u32 1, %s2863_s11  }
  0x5d   : > { %3425 = sst [smem:[#allocation26_spill]] %s3424_s18  ;;  %s3080_s9 = sshll.u32 %s2871_s13, 7 }
  0x5e   : > { %s3084_s21 = sshll.u32 %s3385_s8, 3  ;;  %p3088_p3 = pnand %p2500_p1, %p3051_p8 }
  0x5f   : > { %s375_s23 = sand.u32 1, %s2875_s14   ;;  %s3427_s1 = sld [smem:[#allocation27_spill]] }
  0x60   : > { %s3426_s20 = scalar_select %p3088_p3, 1, 0 }
  0x61   : > { %s379_s5 = scalar_lea.vmem [#allocation5], %s3084_s21  ;;  %s3102_s26 = scalar_lea.sflag [#allocation6], %s375_s23 }
  0x62   : > { %s387_s8 = sshll.u32 %s379_s5, 4  ;;  %p3108_p8 = pneg %p3088_p3  ;;  %s3100_s8 = int_to_ptr.vmem [resolvable:$true] %s387_s8 }
  0x64   : > { %s3428_s13 = scalar_select %p3108_p8, 1, 0 }
  0x65   : > { %s3097_s3 = scalar_lea.hbm %s3427_s1, %s3080_s9  ;;  %s2640_s17 = scalar_lea.hbm %s3427_s1, 384 }
  0x66   : > { %s2635_s24 = scalar_lea.hbm %s3097_s3, 128  ;;  %p2641_p11 = scmp.lt.u32.totalorder %s3097_s3, %s3427_s1 }
  0x67   : > { %p2636_p6 = scmp.ne.s32.totalorder %s3097_s3, %s2635_s24  ;;  %p2642_p12 = scmp.lt.u32.totalorder %s2640_s17, %s2635_s24 }
  0x68   : > { %p2644_p1 = scmp.lt.u32.totalorder %s2635_s24, %s3097_s3 }
  0x69   : > { %p2638_p9 = pnand %p3108_p8, %p2636_p6  ;;  %p2643_p2 = por %p2642_p12, %p2641_p11 }
  0x6b   : > { %p2639_p10 = pneg %p2638_p9  ;;  %p2645_p4 = por %p2644_p1, %p2643_p2 }
  0x6d   : > { %p2646_p0 = pnand %p2645_p4, %p2639_p10 }
  0x6f   : > { %2649 = shalt.err (!%p2646_p0)
}
  0x70   : > { %s2650_s23 = scalar_lea.vmem %s3100_s8, 128  ;;  %s2881_s22 = smov [#allocation5]  }
  0x71   : > { %p2651_p6 = scmp.ne.s32.totalorder %s3100_s8, %s2650_s23  ;;  %s2655_s25 = sshll.u32 %s2881_s22, 4  ;;  %s2656_s25 = int_to_ptr.vmem [resolvable:$false] %s2655_s25 }
  0x72   : > { %s2657_s18 = scalar_lea.vmem %s2656_s25, 256  ;;  %p2658_p5 = scmp.lt.s32.totalorder %s3100_s8, %s2656_s25 }
  0x73   : > { %p2653_p9 = pnand %p2651_p6, %p3108_p8  ;;  %p2659_p7 = scmp.lt.s32.totalorder %s2657_s18, %s2650_s23 }
  0x75   : > { %p2654_p13 = pneg %p2653_p9  ;;  %p2660_p11 = por %p2659_p7, %p2658_p5 }
  0x77   : > { %p2661_p12 = pnand %p2660_p11, %p2654_p13 }
  0x79   : > { %2664 = shalt.err (!%p2661_p12)
}
  0x7a   : > { %2488 = dma.hbm_to_vmem [thread:$0]  (!%p3088_p3), %s3097_s3, 128, %s3100_s8, %s3102_s26  }
  0x7b   : > { %s2882_s24 = smov [#allocation10]   ;;  %s2883_s5 = smov [#allocation13]  }
  0x7c   : > { %s310_s17 = sshll.u32 %s2882_s24, 4  ;;  %s339_s1 = sshll.u32 %s2883_s5, 4  ;;  %s311_s17 = int_to_ptr.vmem [resolvable:$true] %s310_s17  ;;  %s340_s1 = int_to_ptr.vmem [resolvable:$true] %s339_s1 }
  0x7d   : > { %s2665_s25 = scalar_lea.hbm %s3374_s4, 2048  ;;  %p3429_p7 = scmp.ne.s32.totalorder %s3415_s27, 0 }
  0x7e   : > { %p2666_p5 = scmp.ne.s32.totalorder %s3374_s4, %s2665_s25  ;;  %p2672_p4 = scmp.lt.u32.totalorder %s2665_s25, %s3374_s4 }
  0x80   : > { %p2668_p13 = pnand %p2666_p5, %p3429_p7 }
  0x82   : > { %p2669_p0 = pneg %p2668_p13 }
  0x84   : > { %p2674_p10 = pnand %p2672_p4, %p2669_p0 }
  0x86   : > { %2677 = shalt.err (!%p2674_p10)
}
  0x87   : > { %s2678_s3 = scalar_lea.vmem %s311_s17, 2048  ;;  %p2686_p9 = scmp.lt.s32.totalorder %s311_s17, %s311_s17 }
  0x88   : > { %p2679_p2 = scmp.ne.s32.totalorder %s311_s17, %s2678_s3  ;;  %p2687_p11 = scmp.lt.s32.totalorder %s2678_s3, %s2678_s3 }
  0x8a   : > { %p2681_p1 = pnand %p2679_p2, %p3429_p7  ;;  %p2688_p12 = por %p2687_p11, %p2686_p9 }
  0x8c   : > { %p2682_p6 = pneg %p2681_p1 }
  0x8e   : > { %p2689_p3 = pnand %p2688_p12, %p2682_p6 }
  0x90   : > { %2692 = shalt.err (!%p2689_p3)
}
  0x91   : > { %p3430_p5 = scmp.ne.s32.totalorder %s3413_s19, 0  ;;  %s3431_s30 = smov 64  }
  0x92   : > { %s3432_s8 = smov 1024   ;;  %s2693_s22 = scalar_lea.hbm %s3377_s7, 16384 }
  0x93   : > { %2475 = dma.hbm_to_vmem [thread:$0]  (!%p3430_p5), %s3374_s4, 2048, %s311_s17, [#allocation9], %s3432_s8, %s3432_s8, %s3431_s30  }
  0x94   : > { %p2694_p13 = scmp.ne.s32.totalorder %s3377_s7, %s2693_s22  ;;  %p2700_p4 = scmp.lt.u32.totalorder %s2693_s22, %s3377_s7 }
  0x96   : > { %p2696_p3 = pnand %p2694_p13, %p3429_p7 }
  0x98   : > { %p2697_p0 = pneg %p2696_p3 }
  0x9a   : > { %p2702_p10 = pnand %p2700_p4, %p2697_p0 }
  0x9c   : > { %2705 = shalt.err (!%p2702_p10)
}
  0x9d   : > { %s2706_s14 = scalar_lea.vmem %s340_s1, 16384  ;;  %p2714_p9 = scmp.lt.s32.totalorder %s340_s1, %s340_s1 }
  0x9e   : > { %p2707_p2 = scmp.ne.s32.totalorder %s340_s1, %s2706_s14  ;;  %p2715_p11 = scmp.lt.s32.totalorder %s2706_s14, %s2706_s14 }
  0xa0   : > { %p2709_p1 = pnand %p2707_p2, %p3429_p7  ;;  %p2716_p12 = por %p2715_p11, %p2714_p9 }
  0xa2   : > { %p2710_p6 = pneg %p2709_p1 }
  0xa4   : > { %p2717_p8 = pnand %p2716_p12, %p2710_p6 }
  0xa6   : > { %2720 = shalt.err (!%p2717_p8)
}
  0xa7   : > { %s2884_s17 = smov 128   ;;  %s2885_s30 = smov 8  }
  0xa8   : > { %2481 = dma.hbm_to_vmem [thread:$0]  (!%p3430_p5), %s3377_s7, 16384, %s340_s1, [#allocation12], %s2884_s17, %s2884_s17, %s2885_s30  }
  0xa9   : > { %s3175_s5 = scalar_lea.hbm %s3370_s0, %s3080_s9  ;;  %s360_s22 = scalar_lea.vmem [#allocation2], %s3084_s21 }
  0xaa   : > { %s368_s25 = sshll.u32 %s360_s22, 4  ;;  %s3184_s19 = scalar_lea.hbm %s3372_s2, %s3080_s9  ;;  %s3178_s25 = int_to_ptr.vmem [resolvable:$true] %s368_s25 }
  0xab   : > { %s3433_s3 = sand.u32 1, %s2863_s11   ;;  %s2721_s14 = scalar_lea.hbm %s3175_s5, 128 }
  0xac   : > { %s357_s1 = scalar_lea.sflag [#allocation3], %s3433_s3  ;;  %p2722_p8 = scmp.ne.s32.totalorder %s3175_s5, %s2721_s14 }
  0xad   : > { %p3434_p7 = scmp.ne.s32.totalorder %s3428_s13, 0  ;;  %s2726_s8 = scalar_lea.hbm %s3370_s0, 384 }
  0xae   : > { %p2727_p3 = scmp.lt.u32.totalorder %s3175_s5, %s3370_s0  ;;  %p2728_p0 = scmp.lt.u32.totalorder %s2726_s8, %s2721_s14 }
  0xaf   : > { %p2724_p5 = pnand %p2722_p8, %p3434_p7  ;;  %p2730_p10 = scmp.lt.u32.totalorder %s2721_s14, %s3175_s5 }
  0xb0   : > { %p2729_p4 = por %p2728_p0, %p2727_p3 }
  0xb1   : > { %p2725_p13 = pneg %p2724_p5 }
  0xb2   : > { %p2731_p2 = por %p2730_p10, %p2729_p4 }
  0xb4   : > { %p2732_p1 = pnand %p2731_p2, %p2725_p13 }
  0xb6   : > { %2735 = shalt.err (!%p2732_p1)
}
  0xb7   : > { %s2736_s9 = scalar_lea.vmem %s3178_s25, 128  ;;  %s2886_s24 = smov [#allocation2]  }
  0xb8   : > { %p2737_p6 = scmp.ne.s32.totalorder %s3178_s25, %s2736_s9  ;;  %s2741_s22 = sshll.u32 %s2886_s24, 4  ;;  %s2742_s22 = int_to_ptr.vmem [resolvable:$false] %s2741_s22 }
  0xb9   : > { %s2743_s23 = scalar_lea.vmem %s2742_s22, 256  ;;  %p2744_p12 = scmp.lt.s32.totalorder %s3178_s25, %s2742_s22 }
  0xba   : > { %p2739_p9 = pnand %p2737_p6, %p3434_p7  ;;  %p2745_p8 = scmp.lt.s32.totalorder %s2743_s23, %s2736_s9 }
  0xbc   : > { %p2740_p11 = pneg %p2739_p9  ;;  %p2746_p5 = por %p2745_p8, %p2744_p12 }
  0xbe   : > { %p2747_p3 = pnand %p2746_p5, %p2740_p11 }
  0xc0   : > { %2750 = shalt.err (!%p2747_p3)
}
  0xc1   : > { %p3435_p13 = scmp.ne.s32.totalorder %s3426_s20, 0  ;;  %s398_s18 = scalar_lea.vmem [#allocation7], %s3084_s21 }
  0xc2   : > { %s406_s3 = sshll.u32 %s398_s18, 4  ;;  %s2751_s14 = scalar_lea.hbm %s3184_s19, 128  ;;  %s407_s3 = int_to_ptr.vmem [resolvable:$true] %s406_s3 }
  0xc3   : > { %2485 = dma.hbm_to_vmem [thread:$0]  (!%p3435_p13), %s3175_s5, 128, %s3178_s25, %s357_s1  }
  0xc4   : > { %p2752_p0 = scmp.ne.s32.totalorder %s3184_s19, %s2751_s14  ;;  %s2756_s8 = scalar_lea.hbm %s3372_s2, 384 }
  0xc5   : > { %p2757_p2 = scmp.lt.u32.totalorder %s3184_s19, %s3372_s2  ;;  %p2758_p1 = scmp.lt.u32.totalorder %s2756_s8, %s2751_s14 }
  0xc6   : > { %p2754_p4 = pnand %p2752_p0, %p3434_p7  ;;  %p2760_p9 = scmp.lt.u32.totalorder %s2751_s14, %s3184_s19 }
  0xc7   : > { %p2759_p6 = por %p2758_p1, %p2757_p2 }
  0xc8   : > { %p2755_p10 = pneg %p2754_p4 }
  0xc9   : > { %p2761_p11 = por %p2760_p9, %p2759_p6 }
  0xcb   : > { %p2762_p12 = pnand %p2761_p11, %p2755_p10 }
  0xcd   : > { %2765 = shalt.err (!%p2762_p12)
}
  0xce   : > { %s2766_s21 = scalar_lea.vmem %s407_s3, 128  ;;  %s2887_s5 = smov [#allocation7]  }
  0xcf   : > { %p2767_p8 = scmp.ne.s32.totalorder %s407_s3, %s2766_s21  ;;  %s2771_s25 = sshll.u32 %s2887_s5, 4  ;;  %s2772_s25 = int_to_ptr.vmem [resolvable:$false] %s2771_s25 }
  0xd0   : > { %s2773_s1 = scalar_lea.vmem %s2772_s25, 256  ;;  %p2774_p0 = scmp.lt.s32.totalorder %s407_s3, %s2772_s25 }
  0xd1   : > { %p2769_p5 = pnand %p2767_p8, %p3434_p7  ;;  %p2775_p4 = scmp.lt.s32.totalorder %s2773_s1, %s2766_s21 }
  0xd3   : > { %p2770_p3 = pneg %p2769_p5  ;;  %p2776_p13 = por %p2775_p4, %p2774_p0 }
  0xd5   : > { %p2777_p1 = pnand %p2776_p13, %p2770_p3 }
  0xd7   : > { %2780 = shalt.err (!%p2777_p1)
}
  0xd8   : > { %p3436_p2 = scmp.ne.s32.totalorder %s3426_s20, 0  ;;  %p3437_p10 = scmp.ne.s32.totalorder %s3412_s16, 0 }
  0xd9   : > { %s3231_s13 = sand.u32 (!%p3437_p10), 1, %s2859_s10   ;;  %p3438_p7 = scmp.ne.s32.totalorder (!%p3437_p10), %s3420_s28, 0 }
  0xda   : > { %2491 = dma.hbm_to_vmem [thread:$0]  (!%p3436_p2), %s3184_s19, 128, %s407_s3, %s3102_s26  }
  0xdb   : > { %415 = sbr.rel (%p3437_p10) target bundleno = 753 (0x2f1), region = 56  ;;  %s3234_s9 = sshll.u32 (!%p3437_p10), %s3231_s13, 3 }
  0xdc   : > { %s418_s24 = scalar_lea.sflag (!%p3437_p10), [#allocation3], %s3231_s13  ;;  %s421_s22 = scalar_lea.vmem (!%p3437_p10), [#allocation2], %s3234_s9 }
  0xe2   : > { %2834 = dma.done.wait (%p3438_p7), %s418_s24, 128  }
  0xe3   : > { %2836 = vsyncadd (%p3438_p7), %s418_s24, 4294967168  ;;  %s426_s16 = sand.u32 1, %s2971_s15   ;;  %s430_s26 = scalar_lea.vmem [#allocation5], %s3234_s9 }
  0xe4   : > { %s427_s20 = scalar_lea.sflag [#allocation6], %s426_s16 }
  0xe5   : > { %2838 = dma.done.wait (%p3438_p7), %s427_s20, 256  }
  0xe6   : > { %2840 = vsyncadd (%p3438_p7), %s427_s20, 4294967040  ;;  %s439_s19 = scalar_lea.vmem [#allocation7], %s3234_s9  ;;  %p3439_p13 = scmp.eq.s32.totalorder %s2971_s15, 0 }
  0xe8   : > { %2842 = dma.done.wait (%p3439_p13), [#allocation9], 4096   ;;  %p3440_p6 = pmov %p3439_p13 }
  0xea   : > { %2844 = vsyncadd (%p3440_p6), [#allocation9], 4294963200  ;;  %p3441_p9 = pmov %p3440_p6 }
  0xeb   : > { %p3442_p11 = pmov %p3440_p6 }
  0xec   : > { %2846 = dma.done.wait (%p3441_p9), [#allocation12], 18432  }
  0xed   : > { %2848 = vsyncadd (%p3442_p11), [#allocation12], 4294948864  ;;  %v2888_v0 = vmov 0.0   ;;  %v519_v1 = vld [vmem:[#allocation10 + $0x8] sm:$0xff]  ;;  %v521_v3 = vld [vmem:[#allocation10 + $0x18] sm:$0xff]  ;;  %vm534_vm0 = vcmask 130048  }
  0xee   : > { %602 = vmatprep.mubr.f32.mxu0 %v2888_v0  ;;  %673 = vmatprep.mubr.f32.mxu1 %v2888_v0  ;;  %v527_v2 = vld [vmem:[#allocation10 + $0x48] sm:$0xff]  ;;  %v529_v5 = vld [vmem:[#allocation10 + $0x58] sm:$0xff]  ;;  %v518_v6 = vld [vmem:[#allocation10] sm:$0xff]  ;;  %s3443_s3 = sld [smem:[#allocation30_spill]]  ;;  %s3444_s14 = sld [smem:[#allocation24_spill]] }
  0xef   : > { %v2253_v4 = vpack.c.bf16 %v527_v2, %v519_v1  ;;  %v526_v7 = vld [vmem:[#allocation10 + $0x40] sm:$0xff]  ;;  %v2257_v8 = vpack.c.bf16 %v529_v5, %v521_v3  ;;  %v520_v10 = vld [vmem:[#allocation10 + $0x10] sm:$0xff]  ;;  %v523_v14 = vld [vmem:[#allocation10 + $0x28] sm:$0xff]  ;;  %s2110_s17 = sshll.u32 %s2867_s12, 7  ;;  %s499_s30 = scalar_lea.vmem [#allocation14], %s3234_s9 }
  0xf0   : > { %v2255_v9 = vpack.c.bf16 %v526_v7, %v518_v6  ;;  %v528_v11 = vld [vmem:[#allocation10 + $0x50] sm:$0xff]  ;;  %v517_v12 = vld [vmem:[%s430_s26] sm:$0xff]  ;;  %v525_v16 = vld [vmem:[#allocation10 + $0x38] sm:$0xff]  ;;  %s1910_s8 = sshll.u32 %s499_s30, 4  ;;  %s3445_s21 = sld [smem:[#allocation31_spill]]  ;;  %s3324_s8 = int_to_ptr.vmem [resolvable:$true] %s1910_s8 }
  0xf1   : > { %2254 = vmatprep.subr.bf16.mxu0 %v2253_v4  ;;  %v2259_v13 = vpack.c.bf16 %v528_v11, %v520_v10  ;;  %v531_v15 = vld [vmem:[#allocation10 + $0x68] sm:$0xff]  ;;  %2258 = vmatprep.subr.bf16.mxu1 %v2257_v8  ;;  %v533_v18 = vld [vmem:[#allocation10 + $0x78] sm:$0xff]  ;;  %v522_v19 = vld [vmem:[#allocation10 + $0x20] sm:$0xff]  ;;  %s1896_s25 = scalar_lea.sflag [#allocation4], %s3231_s13  ;;  %s2781_s1 = scalar_lea.vmem %s3324_s8, 128 }
  0xf2   : > { %2256 = vmatpush1.bf16.msra.mxu0 %v2255_v9  ;;  %v2261_v17 = vpack.c.bf16 %v531_v15, %v523_v14  ;;  %v530_v20 = vld [vmem:[#allocation10 + $0x60] sm:$0xff]  ;;  %v2265_v21 = vpack.c.bf16 %v533_v18, %v525_v16  ;;  %v524_v23 = vld [vmem:[#allocation10 + $0x30] sm:$0xff]  ;;  %v502_v25 = vld [vmem:[#allocation8 + $0x8] sm:$0xff]  ;;  %p2782_p12 = scmp.ne.s32.totalorder %s3324_s8, %s2781_s1  ;;  %s2889_s12 = smov [#allocation14]  }
  0xf3   : > { %2260 = vmatpush1.bf16.msra.mxu1 %v2259_v13  ;;  %v2263_v22 = vpack.c.bf16 %v530_v20, %v522_v19  ;;  %v532_v24 = vld [vmem:[#allocation10 + $0x70] sm:$0xff]  ;;  %v510_v27 = vld [vmem:[#allocation8 + $0x48] sm:$0xff]  ;;  %v504_v28 = vld [vmem:[#allocation8 + $0x18] sm:$0xff]  ;;  %s2785_s9 = sshll.u32 %s2889_s12, 4  ;;  %s2786_s9 = int_to_ptr.vmem [resolvable:$false] %s2785_s9 }
  0xf4   : > { %2262 = vmatprep.subr.bf16.mxu0 %v2261_v17  ;;  %v2267_v26 = vpack.c.bf16 %v532_v24, %v524_v23  ;;  %v512_v29 = vld [vmem:[#allocation8 + $0x58] sm:$0xff]  ;;  %2266 = vmatprep.subr.bf16.mxu1 %v2265_v21  ;;  %v2269_v30 = vpack.c.bf16 %v510_v27, %v502_v25  ;;  %v501_v32 = vld [vmem:[#allocation8] sm:$0xff]  ;;  %v503_v34 = vld [vmem:[#allocation8 + $0x10] sm:$0xff]  ;;  %p3446_p8 = scmp.ne.s32.totalorder %s3444_s14, 0  ;;  %s2787_s24 = scalar_lea.vmem %s2786_s9, 256 }
  0xf5   : > { %2096 = vmatmul.mubr.msk.f32.vlgmr.msra.gmra.mrb[0].mxu0 %vm534_vm0, %v517_v12  ;;  %v2273_v31 = vpack.c.bf16 %v512_v29, %v504_v28  ;;  %v509_v33 = vld [vmem:[#allocation8 + $0x40] sm:$0xff]  ;;  %v511_v36 = vld [vmem:[#allocation8 + $0x50] sm:$0xff]  ;;  %v506_v37 = vld [vmem:[#allocation8 + $0x28] sm:$0xff]  ;;  %p2788_p0 = scmp.lt.s32.totalorder %s3324_s8, %s2786_s9  ;;  %p2789_p4 = scmp.lt.s32.totalorder %s2787_s24, %s2781_s1 }
  0xf6   : > { %2097 = vmatmul.mubr.msk.f32.vlgmr.msra.gmra.mrb[0].mxu1 %vm534_vm0, %v517_v12  ;;  %2264 = vmatpush1.bf16.msra.mxu0 %v2263_v22  ;;  %v2271_v35 = vpack.c.bf16 %v509_v33, %v501_v32  ;;  %v2275_v38 = vpack.c.bf16 %v511_v36, %v503_v34  ;;  %v514_v39 = vld [vmem:[#allocation8 + $0x68] sm:$0xff]  ;;  %v508_v40 = vld [vmem:[#allocation8 + $0x38] sm:$0xff]  ;;  %v505_v43 = vld [vmem:[#allocation8 + $0x20] sm:$0xff]  ;;  %s3322_s5 = scalar_lea.hbm %s3445_s21, %s2110_s17  ;;  %p2783_p5 = pnand %p2782_p12, %p3446_p8 }
  0xf7   : > { %2268 = vmatpush1.bf16.msra.mxu1 %v2267_v26  ;;  %744 = vmatprep.mubr.f32.mxu0 %v2888_v0  ;;  %v516_v41 = vld [vmem:[#allocation8 + $0x78] sm:$0xff]  ;;  %v2277_v42 = vpack.c.bf16 %v514_v39, %v506_v37  ;;  %v513_v44 = vld [vmem:[#allocation8 + $0x60] sm:$0xff]  ;;  %v507_v45 = vld [vmem:[#allocation8 + $0x30] sm:$0xff]  ;;  %p2790_p1 = por %p2789_p4, %p2788_p0 }
  0xf8   : > { %815 = vmatprep.mubr.f32.mxu1 %v2888_v0  ;;  %2270 = vmatprep.subr.bf16.mxu0 %v2269_v30  ;;  %v2281_v46 = vpack.c.bf16 %v516_v41, %v508_v40  ;;  %v515_v47 = vld [vmem:[#allocation8 + $0x70] sm:$0xff]  ;;  %v1111_v48 = vld [vmem:[#allocation11 + $0x8] sm:$0xff]  ;;  %v2279_v51 = vpack.c.bf16 %v513_v44, %v505_v43  ;;  %v1113_v52 = vld [vmem:[#allocation11 + $0x18] sm:$0xff]  ;;  %p2784_p3 = pneg %p2783_p5 }
  0xf9   : > { %2098 = vmatmul.mubr.msk.f32.vlgmr.msra.gmra.mrb[2].mxu0 %vm534_vm0, %v517_v12  ;;  %2274 = vmatprep.subr.bf16.mxu1 %v2273_v31  ;;  %v1119_v49 = vld [vmem:[#allocation11 + $0x48] sm:$0xff]  ;;  %v500_v50 = vld [vmem:[%s421_s22] sm:$0xff]  ;;  %v2283_v54 = vpack.c.bf16 %v515_v47, %v507_v45  ;;  %v1110_v55 = vld [vmem:[#allocation11] sm:$0xff] }
  0xfa   : > { %2099 = vmatmul.mubr.msk.f32.vlgmr.msra.gmra.mrb[2].mxu1 %vm534_vm0, %v517_v12  ;;  %2272 = vmatpush1.bf16.msra.mxu0 %v2271_v35  ;;  %v1121_v53 = vld [vmem:[#allocation11 + $0x58] sm:$0xff]  ;;  %v1118_v56 = vld [vmem:[#allocation11 + $0x40] sm:$0xff]  ;;  %v2285_v57 = vpack.c.bf16 %v1119_v49, %v1111_v48  ;;  %v1112_v58 = vld [vmem:[#allocation11 + $0x10] sm:$0xff]  ;;  %p2791_p2 = pnand %p2790_p1, %p2784_p3 }
  0xfb   : > { %2276 = vmatpush1.bf16.msra.mxu1 %v2275_v38  ;;  %889 = vmatprep.mubr.f32.mxu0 %v2888_v0  ;;  %v1120_v59 = vld [vmem:[#allocation11 + $0x50] sm:$0xff]  ;;  %v2289_v60 = vpack.c.bf16 %v1121_v53, %v1113_v52  ;;  %v1115_v61 = vld [vmem:[#allocation11 + $0x28] sm:$0xff]  ;;  %v2287_v63 = vpack.c.bf16 %v1118_v56, %v1110_v55  ;;  %v1117_v1 = vld [vmem:[#allocation11 + $0x38] sm:$0xff] }
  0xfc   : > { %960 = vmatprep.mubr.f32.mxu1 %v2888_v0  ;;  %2278 = vmatprep.subr.bf16.mxu0 %v2277_v42  ;;  %v1123_v62 = vld [vmem:[#allocation11 + $0x68] sm:$0xff]  ;;  %v1125_v2 = vld [vmem:[#allocation11 + $0x78] sm:$0xff]  ;;  %v2291_v3 = vpack.c.bf16 %v1120_v59, %v1112_v58  ;;  %v1114_v4 = vld [vmem:[#allocation11 + $0x20] sm:$0xff] }
  0xfd   : > { %2100 = vmatmul.mubr.msk.f32.vlgmr.msra.gmra.mrb[0].mxu0 %vm534_vm0, %v500_v50  ;;  %2282 = vmatprep.subr.bf16.mxu1 %v2281_v46  ;;  %v1122_v5 = vld [vmem:[#allocation11 + $0x60] sm:$0xff]  ;;  %v2293_v6 = vpack.c.bf16 %v1123_v62, %v1115_v61  ;;  %v1116_v7 = vld [vmem:[#allocation11 + $0x30] sm:$0xff]  ;;  %v2297_v9 = vpack.c.bf16 %v1125_v2, %v1117_v1  ;;  %v1496_v11 = vld [vmem:[#allocation13 + $0x88] sm:$0xff] }
  0xfe   : > { %2101 = vmatmul.mubr.msk.f32.vlgmr.msra.gmra.mrb[0].mxu1 %vm534_vm0, %v500_v50  ;;  %2280 = vmatpush1.bf16.msra.mxu0 %v2279_v51  ;;  %v1124_v8 = vld [vmem:[#allocation11 + $0x70] sm:$0xff]  ;;  %v1495_v10 = vld [vmem:[#allocation13 + $0x80] sm:$0xff]  ;;  %v2295_v13 = vpack.c.bf16 %v1122_v5, %v1114_v4  ;;  %v1528_v15 = vld [vmem:[#allocation13 + $0x188] sm:$0xff] }
  0xff   : > { %2284 = vmatpush1.bf16.msra.mxu1 %v2283_v54  ;;  %1031 = vmatprep.mubr.f32.mxu0 %v2888_v0  ;;  %v1109_v12 = vld [vmem:[%s439_s19] sm:$0xff]  ;;  %v1527_v14 = vld [vmem:[#allocation13 + $0x180] sm:$0xff]  ;;  %v2299_v16 = vpack.c.bf16 %v1124_v8, %v1116_v7  ;;  %v1480_v18 = vld [vmem:[#allocation13 + $0x8] sm:$0xff]  ;;  %v2301_v20 = vpack.c.bf16 %v1496_v11, %v1495_v10 }
 0x100   : > { %1102 = vmatprep.mubr.f32.mxu1 %v2888_v0  ;;  %2286 = vmatprep.subr.bf16.mxu0 %v2285_v57  ;;  %v1479_v17 = vld [vmem:[#allocation13] sm:$0xff]  ;;  %v1512_v21 = vld [vmem:[#allocation13 + $0x108] sm:$0xff]  ;;  %v1497_v22 = vld [vmem:[#allocation13 + $0x90] sm:$0xff]  ;;  %v2333_v24 = vpack.c.bf16 %v1528_v15, %v1527_v14 }
 0x101   : > { %2102 = vmatmul.mubr.msk.f32.vlgmr.msra.gmra.mrb[2].mxu0 %vm534_vm0, %v500_v50  ;;  %2290 = vmatprep.subr.bf16.mxu1 %v2289_v60  ;;  %v1511_v19 = vld [vmem:[#allocation13 + $0x100] sm:$0xff]  ;;  %v1498_v23 = vld [vmem:[#allocation13 + $0x98] sm:$0xff]  ;;  %v1529_v25 = vld [vmem:[#allocation13 + $0x190] sm:$0xff]  ;;  %v2303_v27 = vpack.c.bf16 %v1480_v18, %v1479_v17 }
 0x102   : > { %2103 = vmatmul.mubr.msk.f32.vlgmr.msra.gmra.mrb[2].mxu1 %vm534_vm0, %v500_v50  ;;  %2288 = vmatpush1.bf16.msra.mxu0 %v2287_v63  ;;  %v1530_v26 = vld [vmem:[#allocation13 + $0x198] sm:$0xff]  ;;  %v2335_v28 = vpack.c.bf16 %v1512_v21, %v1511_v19  ;;  %v2305_v29 = vpack.c.bf16 %v1498_v23, %v1497_v22  ;;  %v1481_v30 = vld [vmem:[#allocation13 + $0x10] sm:$0xff]  ;;  %v1499_v35 = vld [vmem:[#allocation13 + $0xa0] sm:$0xff] }
 0x103   : > { %2292 = vmatpush1.bf16.msra.mxu1 %v2291_v3  ;;  %1193 = vmatprep.mubr.f32.mxu0 %v2888_v0  ;;  %v1482_v31 = vld [vmem:[#allocation13 + $0x18] sm:$0xff]  ;;  %v1513_v32 = vld [vmem:[#allocation13 + $0x110] sm:$0xff]  ;;  %v2337_v33 = vpack.c.bf16 %v1530_v26, %v1529_v25  ;;  %v1500_v36 = vld [vmem:[#allocation13 + $0xa8] sm:$0xff] }
 0x104   : > { %1264 = vmatprep.mubr.f32.mxu1 %v2888_v0  ;;  %2294 = vmatprep.subr.bf16.mxu0 %v2293_v6  ;;  %v1514_v34 = vld [vmem:[#allocation13 + $0x118] sm:$0xff]  ;;  %v1531_v37 = vld [vmem:[#allocation13 + $0x1a0] sm:$0xff]  ;;  %v1532_v38 = vld [vmem:[#allocation13 + $0x1a8] sm:$0xff]  ;;  %v2307_v39 = vpack.c.bf16 %v1482_v31, %v1481_v30  ;;  %v2309_v41 = vpack.c.bf16 %v1500_v36, %v1499_v35 }
 0x105   : > { %2104 = vmatmul.mubr.msk.f32.vlgmr.msra.gmra.mrb[0].mxu0 %vm534_vm0, %v1109_v12  ;;  %2298 = vmatprep.subr.bf16.mxu1 %v2297_v9  ;;  %v2339_v40 = vpack.c.bf16 %v1514_v34, %v1513_v32  ;;  %v1483_v42 = vld [vmem:[#allocation13 + $0x20] sm:$0xff]  ;;  %v2341_v44 = vpack.c.bf16 %v1532_v38, %v1531_v37  ;;  %v1516_v45 = vld [vmem:[#allocation13 + $0x128] sm:$0xff]  ;;  %v1501_v46 = vld [vmem:[#allocation13 + $0xb0] sm:$0xff] }
 0x106   : > { %2105 = vmatmul.mubr.msk.f32.vlgmr.msra.gmra.mrb[0].mxu1 %vm534_vm0, %v1109_v12  ;;  %2296 = vmatpush1.bf16.msra.mxu0 %v2295_v13  ;;  %v1515_v43 = vld [vmem:[#allocation13 + $0x120] sm:$0xff]  ;;  %v1502_v47 = vld [vmem:[#allocation13 + $0xb8] sm:$0xff]  ;;  %v1533_v48 = vld [vmem:[#allocation13 + $0x1b0] sm:$0xff] }
 0x107   : > { %2300 = vmatpush1.bf16.msra.mxu1 %v2299_v16  ;;  %1335 = vmatprep.mubr.f32.mxu0 %v2888_v0  ;;  %v1534_v49 = vld [vmem:[#allocation13 + $0x1b8] sm:$0xff]  ;;  %v2343_v51 = vpack.c.bf16 %v1516_v45, %v1515_v43  ;;  %v2313_v52 = vpack.c.bf16 %v1502_v47, %v1501_v46  ;;  %v1485_v53 = vld [vmem:[#allocation13 + $0x30] sm:$0xff]  ;;  %v1503_v58 = vld [vmem:[#allocation13 + $0xc0] sm:$0xff] }
 0x108   : > { %1406 = vmatprep.mubr.f32.mxu1 %v2888_v0  ;;  %2302 = vmatprep.subr.bf16.mxu0 %v2301_v20  ;;  %v1484_v0 = vld [vmem:[#allocation13 + $0x28] sm:$0xff]  ;;  %v1486_v54 = vld [vmem:[#allocation13 + $0x38] sm:$0xff]  ;;  %v1517_v55 = vld [vmem:[#allocation13 + $0x130] sm:$0xff]  ;;  %v2345_v56 = vpack.c.bf16 %v1534_v49, %v1533_v48 }
 0x109   : > { %2106 = vmatmul.mubr.msk.f32.vlgmr.msra.gmra.mrb[2].mxu0 %vm534_vm0, %v1109_v12  ;;  %2334 = vmatprep.subr.bf16.mxu1 %v2333_v24  ;;  %v2311_v50 = vpack.c.bf16 %v1484_v0, %v1483_v42  ;;  %v1518_v57 = vld [vmem:[#allocation13 + $0x138] sm:$0xff]  ;;  %v1504_v59 = vld [vmem:[#allocation13 + $0xc8] sm:$0xff]  ;;  %v1535_v60 = vld [vmem:[#allocation13 + $0x1c0] sm:$0xff]  ;;  %v2315_v62 = vpack.c.bf16 %v1486_v54, %v1485_v53 }
 0x10a   : > { %2107 = vmatmul.mubr.msk.f32.vlgmr.msra.gmra.mrb[2].mxu1 %vm534_vm0, %v1109_v12  ;;  %2304 = vmatpush3.bf16.msra.mxu0 %v2303_v27  ;;  %v1536_v61 = vld [vmem:[#allocation13 + $0x1c8] sm:$0xff]  ;;  %v2347_v63 = vpack.c.bf16 %v1518_v57, %v1517_v55  ;;  %v2317_v1 = vpack.c.bf16 %v1504_v59, %v1503_v58  ;;  %v1487_v3 = vld [vmem:[#allocation13 + $0x40] sm:$0xff]  ;;  %v1505_v9 = vld [vmem:[#allocation13 + $0xd0] sm:$0xff] }
 0x10b   : > { %2336 = vmatpush3.bf16.msra.mxu1 %v2335_v28  ;;  %2306 = vmatprep.subr.bf16.mxu0 %v2305_v29  ;;  %v2349_v2 = vpack.c.bf16 %v1536_v61, %v1535_v60  ;;  %v1488_v4 = vld [vmem:[#allocation13 + $0x48] sm:$0xff]  ;;  %v1519_v5 = vld [vmem:[#allocation13 + $0x140] sm:$0xff]  ;;  %v1506_v10 = vld [vmem:[#allocation13 + $0xd8] sm:$0xff] }
 0x10c   : > { %2338 = vmatprep.subr.bf16.mxu1 %v2337_v33  ;;  %v2319_v6 = vpack.c.bf16 %v1488_v4, %v1487_v3  ;;  %v1520_v7 = vld [vmem:[#allocation13 + $0x148] sm:$0xff]  ;;  %v1537_v11 = vld [vmem:[#allocation13 + $0x1d0] sm:$0xff]  ;;  %v2321_v12 = vpack.c.bf16 %v1506_v10, %v1505_v9  ;;  %v1538_v13 = vld [vmem:[#allocation13 + $0x1d8] sm:$0xff] }
 0x10d   : > { %v2351_v8 = vpack.c.bf16 %v1520_v7, %v1519_v5  ;;  %v1489_v14 = vld [vmem:[#allocation13 + $0x50] sm:$0xff]  ;;  %v1490_v15 = vld [vmem:[#allocation13 + $0x58] sm:$0xff]  ;;  %v2353_v16 = vpack.c.bf16 %v1538_v13, %v1537_v11  ;;  %v1507_v21 = vld [vmem:[#allocation13 + $0xe0] sm:$0xff] }
 0x10e   : > { %2308 = vmatpush3.bf16.msra.mxu0 %v2307_v39  ;;  %v2323_v17 = vpack.c.bf16 %v1490_v15, %v1489_v14  ;;  %v1521_v18 = vld [vmem:[#allocation13 + $0x150] sm:$0xff]  ;;  %v1522_v19 = vld [vmem:[#allocation13 + $0x158] sm:$0xff]  ;;  %v1508_v22 = vld [vmem:[#allocation13 + $0xe8] sm:$0xff] }
 0x10f   : > { %2340 = vmatpush3.bf16.msra.mxu1 %v2339_v40  ;;  %2310 = vmatprep.subr.bf16.mxu0 %v2309_v41  ;;  %v2355_v20 = vpack.c.bf16 %v1522_v19, %v1521_v18  ;;  %v1539_v23 = vld [vmem:[#allocation13 + $0x1e0] sm:$0xff]  ;;  %v2325_v24 = vpack.c.bf16 %v1508_v22, %v1507_v21  ;;  %v1540_v25 = vld [vmem:[#allocation13 + $0x1e8] sm:$0xff]  ;;  %v1509_v33 = vld [vmem:[#allocation13 + $0xf0] sm:$0xff] }
 0x110   : > { %2342 = vmatprep.subr.bf16.mxu1 %v2341_v44  ;;  %v1491_v26 = vld [vmem:[#allocation13 + $0x60] sm:$0xff]  ;;  %v1492_v27 = vld [vmem:[#allocation13 + $0x68] sm:$0xff]  ;;  %v2357_v28 = vpack.c.bf16 %v1540_v25, %v1539_v23  ;;  %v1510_v34 = vld [vmem:[#allocation13 + $0xf8] sm:$0xff] }
 0x111   : > { %v2327_v29 = vpack.c.bf16 %v1492_v27, %v1491_v26  ;;  %v1523_v30 = vld [vmem:[#allocation13 + $0x160] sm:$0xff]  ;;  %v1524_v31 = vld [vmem:[#allocation13 + $0x168] sm:$0xff]  ;;  %v1541_v35 = vld [vmem:[#allocation13 + $0x1f0] sm:$0xff]  ;;  %v2329_v36 = vpack.c.bf16 %v1510_v34, %v1509_v33 }
 0x112   : > { %2312 = vmatpush3.bf16.msra.mxu0 %v2311_v50  ;;  %v2359_v32 = vpack.c.bf16 %v1524_v31, %v1523_v30  ;;  %v1542_v37 = vld [vmem:[#allocation13 + $0x1f8] sm:$0xff]  ;;  %v1493_v38 = vld [vmem:[#allocation13 + $0x70] sm:$0xff]  ;;  %v1559_v44 = vld [vmem:[#allocation13 + $0x280] sm:$0xff]  ;;  %v1423_v50 = vlaneseq }
 0x113   : > { %2344 = vmatpush3.bf16.msra.mxu1 %v2343_v51  ;;  %2314 = vmatprep.subr.bf16.mxu0 %v2313_v52  ;;  %v1494_v39 = vld [vmem:[#allocation13 + $0x78] sm:$0xff]  ;;  %v2361_v40 = vpack.c.bf16 %v1542_v37, %v1541_v35  ;;  %v1525_v42 = vld [vmem:[#allocation13 + $0x170] sm:$0xff]  ;;  %v1560_v45 = vld [vmem:[#allocation13 + $0x288] sm:$0xff] }
 0x114   : > { %2346 = vmatprep.subr.bf16.mxu1 %v2345_v56  ;;  %v2331_v41 = vpack.c.bf16 %v1494_v39, %v1493_v38  ;;  %v1526_v0 = vld [vmem:[#allocation13 + $0x178] sm:$0xff]  ;;  %v1591_v46 = vld [vmem:[#allocation13 + $0x380] sm:$0xff]  ;;  %v2365_v47 = vpack.c.bf16 %v1560_v45, %v1559_v44  ;;  %v1592_v48 = vld [vmem:[#allocation13 + $0x388] sm:$0xff]  ;;  %v3285_v51 = vshrl.u32 %v1423_v50, 7 }
 0x115   : > { %v2363_v43 = vpack.c.bf16 %v1526_v0, %v1525_v42  ;;  %v2397_v49 = vpack.c.bf16 %v1592_v48, %v1591_v46  ;;  %v3291_v53 = vld [vmem:[%s3376_s6] sm:$0xff]  ;;  %v1575_v18 = vld [vmem:[#allocation13 + $0x300] sm:$0xff]  ;;  %v1576_v19 = vld [vmem:[#allocation13 + $0x308] sm:$0xff] }
 0x116   : > { %2316 = vmatpush3.bf16.msra.mxu0 %v2315_v62  ;;  %v1425_v52 = vsub.s32 0, %v3285_v51  ;;  %v1429_v54 = vsub.s32 1, %v3285_v51  ;;  %v1433_v55 = vsub.s32 2, %v3285_v51  ;;  %v1437_v56 = vsub.s32 3, %v3285_v51  ;;  %v1562_v21 = vld [vmem:[#allocation13 + $0x298] sm:$0xff]  ;;  %v1593_v22 = vld [vmem:[#allocation13 + $0x390] sm:$0xff] }
 0x117   : > { %2348 = vmatpush3.bf16.msra.mxu1 %v2347_v63  ;;  %2318 = vmatprep.subr.bf16.mxu0 %v2317_v1  ;;  %v1445_v59 = vsub.s32 5, %v3285_v51  ;;  %v1453_v62 = vsub.s32 7, %v3285_v51  ;;  %v1594_v23 = vld [vmem:[#allocation13 + $0x398] sm:$0xff]  ;;  %v2399_v27 = vpack.c.bf16 %v1576_v19, %v1575_v18  ;;  %v1577_v31 = vld [vmem:[#allocation13 + $0x310] sm:$0xff]  ;;  %v1563_v35 = vld [vmem:[#allocation13 + $0x2a0] sm:$0xff] }
 0x118   : > { %2350 = vmatprep.subr.bf16.mxu1 %v2349_v2  ;;  %v1426_v57 = vrot.slane %v3291_v53, %v1425_v52  ;;  %v1430_v58 = vrot.slane %v3291_v53, %v1429_v54  ;;  %v1434_v60 = vrot.slane %v3291_v53, %v1433_v55  ;;  %v1438_v61 = vrot.slane %v3291_v53, %v1437_v56  ;;  %v1546_v30 = vld [vmem:[#allocation13 + $0x218] sm:$0xff]  ;;  %v1595_v38 = vld [vmem:[#allocation13 + $0x3a0] sm:$0xff]  ;;  %v1596_v39 = vld [vmem:[#allocation13 + $0x3a8] sm:$0xff] }
 0x119   : > { %v1454_v9 = vrot.slane %v3291_v53, %v1453_v62  ;;  %v2401_v33 = vpack.c.bf16 %v1594_v23, %v1593_v22  ;;  %v1578_v34 = vld [vmem:[#allocation13 + $0x318] sm:$0xff]  ;;  %v1548_v44 = vld [vmem:[#allocation13 + $0x228] sm:$0xff]  ;;  %v1579_v45 = vld [vmem:[#allocation13 + $0x320] sm:$0xff] }
 0x11a   : > { %2320 = vmatpush3.bf16.msra.mxu0 %v2319_v6  ;;  %v1446_v6 = vrot.slane %v3291_v53, %v1445_v59  ;;  %v2403_v42 = vpack.c.bf16 %v1578_v34, %v1577_v31  ;;  %v1580_v48 = vld [vmem:[#allocation13 + $0x328] sm:$0xff]  ;;  %v1566_v50 = vld [vmem:[#allocation13 + $0x2b8] sm:$0xff]  ;;  %v1597_v52 = vld [vmem:[#allocation13 + $0x3b0] sm:$0xff] }
 0x11b   : > { %2352 = vmatpush3.bf16.msra.mxu1 %v2351_v8  ;;  %2322 = vmatprep.subr.bf16.mxu0 %v2321_v12  ;;  %v1598_v54 = vld [vmem:[#allocation13 + $0x3b8] sm:$0xff]  ;;  %v2407_v56 = vpack.c.bf16 %v1580_v48, %v1579_v45  ;;  %v1601_v18 = vld [vmem:[#allocation13 + $0x3d0] sm:$0xff]  ;;  %v1603_v31 = vld [vmem:[#allocation13 + $0x3e0] sm:$0xff] }
 0x11c   : > { %2354 = vmatprep.subr.bf16.mxu1 %v2353_v16  ;;  %v1543_v16 = vld [vmem:[#allocation13 + $0x200] sm:$0xff]  ;;  %v1550_v59 = vld [vmem:[#allocation13 + $0x238] sm:$0xff] }
 0x11d   : > { %v1582_v62 = vld [vmem:[#allocation13 + $0x338] sm:$0xff] }
 0x11e   : > { %2324 = vmatpush3.bf16.msra.mxu0 %v2323_v17  ;;  %v1544_v17 = vld [vmem:[#allocation13 + $0x208] sm:$0xff]  ;;  %v1602_v19 = vld [vmem:[#allocation13 + $0x3d8] sm:$0xff] }
 0x11f   : > { %2356 = vmatpush3.bf16.msra.mxu1 %v2355_v20  ;;  %2326 = vmatprep.subr.bf16.mxu0 %v2325_v24  ;;  %v1561_v20 = vld [vmem:[#allocation13 + $0x290] sm:$0xff]  ;;  %v2367_v25 = vpack.c.bf16 %v1544_v17, %v1543_v16  ;;  %v1570_v17 = vld [vmem:[#allocation13 + $0x2d8] sm:$0xff] }
 0x120   : > { %2358 = vmatprep.subr.bf16.mxu1 %v2357_v28  ;;  %v2369_v28 = vpack.c.bf16 %v1562_v21, %v1561_v20  ;;  %v1569_v16 = vld [vmem:[#allocation13 + $0x2d0] sm:$0xff] }
 0x121   : > { %v2385_v23 = vpack.c.bf16 %v1570_v17, %v1569_v16 }
 0x122   : > { %2328 = vmatpush3.bf16.msra.mxu0 %v2327_v29  ;;  %v1545_v29 = vld [vmem:[#allocation13 + $0x210] sm:$0xff] }
 0x123   : > { %2360 = vmatpush3.bf16.msra.mxu1 %v2359_v32  ;;  %2330 = vmatprep.subr.bf16.mxu0 %v2329_v36  ;;  %v1564_v36 = vld [vmem:[#allocation13 + $0x2a8] sm:$0xff] }
 0x124   : > { %2362 = vmatprep.subr.bf16.mxu1 %v2361_v40  ;;  %v2371_v40 = vpack.c.bf16 %v1546_v30, %v1545_v29  ;;  %v2373_v0 = vpack.c.bf16 %v1564_v36, %v1563_v35  ;;  %v1571_v29 = vld [vmem:[#allocation13 + $0x2e0] sm:$0xff]  ;;  %v1572_v30 = vld [vmem:[#allocation13 + $0x2e8] sm:$0xff] }
 0x125   : > { %v2389_v36 = vpack.c.bf16 %v1572_v30, %v1571_v29 }
 0x126   : > { %2332 = vmatpush3.bf16.msra.mxu0 %v2331_v41 }
 0x127   : > { %2364 = vmatpush3.bf16.msra.mxu1 %v2363_v43  ;;  %2366 = vmatprep.subr.bf16.mxu0 %v2365_v47  ;;  %v1547_v43 = vld [vmem:[#allocation13 + $0x220] sm:$0xff]  ;;  %v2405_v47 = vpack.c.bf16 %v1596_v39, %v1595_v38  ;;  %v1556_v38 = vld [vmem:[#allocation13 + $0x268] sm:$0xff] }
 0x128   : > { %2398 = vmatprep.subr.bf16.mxu1 %v2397_v49  ;;  %v1565_v49 = vld [vmem:[#allocation13 + $0x2b0] sm:$0xff]  ;;  %v2375_v55 = vpack.c.bf16 %v1548_v44, %v1547_v43  ;;  %v1587_v39 = vld [vmem:[#allocation13 + $0x360] sm:$0xff]  ;;  %v1606_v44 = vld [vmem:[#allocation13 + $0x3f8] sm:$0xff] }
 0x129   : > { %v1605_v43 = vld [vmem:[#allocation13 + $0x3f0] sm:$0xff] }
 0x12a   : > { %v2425_v48 = vpack.c.bf16 %v1606_v44, %v1605_v43 }
 0x1d8   : > { %v1195_v63 = vpop.f32.mrb[0].mxu0 }
 0x1d9   : > { %v1463_v1 = vadd.f32 %v1426_v57, %v1195_v63  ;;  %v1266_v2 = vpop.f32.mrb[0].mxu1  ;;  %v1197_v3 = vpop.f32.mrb[1].mxu0  ;;  %v2377_v57 = vpack.c.bf16 %v1566_v50, %v1565_v49  ;;  %v1567_v63 = vld [vmem:[#allocation13 + $0x2c0] sm:$0xff]  ;;  %v1589_v49 = vld [vmem:[#allocation13 + $0x370] sm:$0xff]  ;;  %v1590_v50 = vld [vmem:[#allocation13 + $0x378] sm:$0xff] }
 0x1da   : > { %v1464_v4 = vadd.f32 %v1430_v58, %v1197_v3  ;;  %v1268_v5 = vpop.f32.mrb[1].mxu1  ;;  %v1465_v7 = vadd.f32 %v1434_v60, %v1266_v2  ;;  %v1549_v58 = vld [vmem:[#allocation13 + $0x230] sm:$0xff]  ;;  %v1599_v2 = vld [vmem:[#allocation13 + $0x3c0] sm:$0xff]  ;;  %v1600_v3 = vld [vmem:[#allocation13 + $0x3c8] sm:$0xff] }
 0x1db   : > { %v1466_v8 = vadd.f32 %v1438_v61, %v1268_v5  ;;  %2563 = vtanh.f32 %v1463_v1  ;;  %v1581_v60 = vld [vmem:[#allocation13 + $0x330] sm:$0xff]  ;;  %v2409_v61 = vpack.c.bf16 %v1598_v54, %v1597_v52  ;;  %v1568_v1 = vld [vmem:[#allocation13 + $0x2c8] sm:$0xff]  ;;  %v2379_v5 = vpack.c.bf16 %v1550_v59, %v1549_v58 }
 0x1dc   : > { %v3304_v10 = vpop.f32.mrb[2].mxu0  ;;  %2565 = vtanh.f32 %v1464_v4  ;;  %v1441_v4 = vsub.s32 4, %v3285_v51  ;;  %v2427_v54 = vpack.c.bf16 %v1590_v50, %v1589_v49  ;;  %v2108_v59 = vld [vmem:[%s3443_s3] ss:$0 sm:$0xff] }
 0x1dd   : > { %v3306_v11 = vpop.f32.mrb[2].mxu1  ;;  %v1339_v12 = vpop.f32.mrb[3].mxu0  ;;  %2567 = vtanh.f32 %v1466_v8  ;;  %v2381_v8 = vpack.c.bf16 %v1568_v1, %v1567_v63 }
 0x1de   : > { %v1468_v13 = vadd.f32 %v1446_v6, %v1339_v12  ;;  %v1410_v14 = vpop.f32.mrb[3].mxu1  ;;  %2569 = vtanh.f32 %v1465_v7  ;;  %v1449_v6 = vsub.s32 6, %v3285_v51  ;;  %v2411_v7 = vpack.c.bf16 %v1582_v62, %v1581_v60  ;;  %v1552_v12 = vld [vmem:[#allocation13 + $0x248] sm:$0xff] }
 0x1df   : > { %v1470_v15 = vadd.f32 %v1454_v9, %v1410_v14  ;;  %v1551_v9 = vld [vmem:[#allocation13 + $0x240] sm:$0xff]  ;;  %v2413_v14 = vpack.c.bf16 %v1600_v3, %v1599_v2  ;;  %v1442_v20 = vrot.slane %v3291_v53, %v1441_v4 }
 0x1e0   : > { %2571 = vtanh.f32 %v1468_v13  ;;  %v1583_v13 = vld [vmem:[#allocation13 + $0x340] sm:$0xff]  ;;  %v2383_v21 = vpack.c.bf16 %v1552_v12, %v1551_v9  ;;  %v1450_v51 = vrot.slane %v3291_v53, %v1449_v6 }
 0x1e1   : > { %2573 = vtanh.f32 %v1470_v15  ;;  %v1584_v15 = vld [vmem:[#allocation13 + $0x348] sm:$0xff] }
 0x1e2   : > { %v2415_v22 = vpack.c.bf16 %v1584_v15, %v1583_v13  ;;  %v1469_v53 = vadd.f32 %v1450_v51, %v3306_v11 }
 0x1e5   : > { %v2564_v24 = vpop.eup %2563 }
 0x1e6   : > { %v2566_v26 = vpop.eup %2565 }
 0x1e7   : > { %v2568_v32 = vpop.eup %2567  ;;  %1678 = vmatprep.mubr.f32.mxu0 %v2566_v26  ;;  %v1585_v26 = vld [vmem:[#allocation13 + $0x350] sm:$0xff] }
 0x1e8   : > { %v2570_v37 = vpop.eup %2569  ;;  %1748 = vmatprep.mubr.f32.mxu1 %v2568_v32  ;;  %1679 = vmatmul.mubr.f32.vlgmr.msra.gmra.mrb[4].mxu0 %v2564_v24  ;;  %v1553_v24 = vld [vmem:[#allocation13 + $0x250] sm:$0xff]  ;;  %v1604_v32 = vld [vmem:[#allocation13 + $0x3e8] sm:$0xff] }
 0x1e9   : > { %1749 = vmatmul.mubr.f32.vlgmr.msra.gmra.mrb[4].mxu1 %v2570_v37  ;;  %2368 = vmatpush3.bf16.msra.mxu0 %v2367_v25  ;;  %v1554_v25 = vld [vmem:[#allocation13 + $0x258] sm:$0xff]  ;;  %v1555_v37 = vld [vmem:[#allocation13 + $0x260] sm:$0xff] }
 0x1ea   : > { %v2572_v41 = vpop.eup %2571  ;;  %2400 = vmatpush3.bf16.msra.mxu1 %v2399_v27  ;;  %2370 = vmatprep.subr.bf16.mxu0 %v2369_v28  ;;  %v2417_v27 = vpack.c.bf16 %v1602_v19, %v1601_v18  ;;  %v1586_v28 = vld [vmem:[#allocation13 + $0x358] sm:$0xff]  ;;  %v2387_v34 = vpack.c.bf16 %v1554_v25, %v1553_v24 }
 0x1eb   : > { %v2574_v46 = vpop.eup %2573  ;;  %1818 = vmatprep.mubr.f32.mxu0 %v2572_v41  ;;  %2402 = vmatprep.subr.bf16.mxu1 %v2401_v33  ;;  %v1467_v33 = vadd.f32 %v1442_v20, %v3304_v10  ;;  %v2419_v35 = vpack.c.bf16 %v1586_v28, %v1585_v26  ;;  %v1588_v41 = vld [vmem:[#allocation13 + $0x368] sm:$0xff]  ;;  %v2391_v10 = vpack.c.bf16 %v1556_v38, %v1555_v37 }
 0x1ec   : > { %1888 = vmatprep.mubr.f32.mxu1 %v2574_v46  ;;  %v2423_v11 = vpack.c.bf16 %v1588_v41, %v1587_v39  ;;  %v1557_v46 = vld [vmem:[#allocation13 + $0x270] sm:$0xff] }
 0x1ed   : > { %2372 = vmatpush3.bf16.msra.mxu0 %v2371_v40  ;;  %v2421_v40 = vpack.c.bf16 %v1604_v32, %v1603_v31  ;;  %2575 = vtanh.f32 %v1467_v33 }
 0x1ee   : > { %2404 = vmatpush3.bf16.msra.mxu1 %v2403_v42  ;;  %2374 = vmatprep.subr.bf16.mxu0 %v2373_v0  ;;  %v1573_v42 = vld [vmem:[#allocation13 + $0x2f0] sm:$0xff]  ;;  %v1574_v0 = vld [vmem:[#allocation13 + $0x2f8] sm:$0xff]  ;;  %2577 = vtanh.f32 %v1469_v53 }
 0x1ef   : > { %2406 = vmatprep.subr.bf16.mxu1 %v2405_v47  ;;  %v2393_v45 = vpack.c.bf16 %v1574_v0, %v1573_v42  ;;  %v1558_v47 = vld [vmem:[#allocation13 + $0x278] sm:$0xff] }
 0x1f0   : > { %v2395_v52 = vpack.c.bf16 %v1558_v47, %v1557_v46 }
 0x1f1   : > { %2376 = vmatpush3.bf16.msra.mxu0 %v2375_v55 }
 0x1f2   : > { %2408 = vmatpush3.bf16.msra.mxu1 %v2407_v56  ;;  %2378 = vmatprep.subr.bf16.mxu0 %v2377_v57 }
 0x1f3   : > { %2410 = vmatprep.subr.bf16.mxu1 %v2409_v61 }
 0x1f5   : > { %2380 = vmatpush3.bf16.msra.mxu0 %v2379_v5 }
 0x1f6   : > { %2412 = vmatpush3.bf16.msra.mxu1 %v2411_v7  ;;  %2382 = vmatprep.subr.bf16.mxu0 %v2381_v8 }
 0x1f7   : > { %2414 = vmatprep.subr.bf16.mxu1 %v2413_v14  ;;  %v2576_v55 = vpop.eup %2575 }
 0x1f8   : > { %v2578_v56 = vpop.eup %2577 }
 0x1f9   : > { %2384 = vmatpush3.bf16.msra.mxu0 %v2383_v21 }
 0x1fa   : > { %2416 = vmatpush3.bf16.msra.mxu1 %v2415_v22  ;;  %2386 = vmatprep.subr.bf16.mxu0 %v2385_v23 }
 0x1fb   : > { %2418 = vmatprep.subr.bf16.mxu1 %v2417_v27 }
 0x1fd   : > { %2388 = vmatpush3.bf16.msra.mxu0 %v2387_v34 }
 0x1fe   : > { %2420 = vmatpush3.bf16.msra.mxu1 %v2419_v35  ;;  %2390 = vmatprep.subr.bf16.mxu0 %v2389_v36 }
 0x1ff   : > { %2422 = vmatprep.subr.bf16.mxu1 %v2421_v40 }
 0x201   : > { %2392 = vmatpush3.bf16.msra.mxu0 %v2391_v10 }
 0x202   : > { %2424 = vmatpush3.bf16.msra.mxu1 %v2423_v11  ;;  %2394 = vmatprep.subr.bf16.mxu0 %v2393_v45 }
 0x203   : > { %2426 = vmatprep.subr.bf16.mxu1 %v2425_v48 }
 0x205   : > { %2396 = vmatpush3.bf16.msra.mxu0 %v2395_v52 }
 0x206   : > { %2428 = vmatpush3.bf16.msra.mxu1 %v2427_v54 }
 0x208   : > { %1819 = vmatmul.mubr.f32.vlgmr.msra.gmra.mrb[6].mxu0 %v2576_v55 }
 0x209   : > { %1889 = vmatmul.mubr.f32.vlgmr.msra.gmra.mrb[6].mxu1 %v2578_v56 }
 0x2bb   : > { %v2145_v57 = vpop.f32.mrb[4].mxu0 }
 0x2bc   : > { %v2180_v58 = vpop.f32.mrb[4].mxu1  ;;  %v2146_v60 = vpop.f32.mrb[5].mxu0 }
 0x2bd   : > { %v2147_v61 = vadd.f32 %v2146_v60, %v2145_v57  ;;  %v2181_v62 = vpop.f32.mrb[5].mxu1 }
 0x2be   : > { %v2182_v63 = vadd.f32 %v2181_v62, %v2180_v58 }
 0x2bf   : > { %v1681_v1 = vadd.f32 %v2147_v61, %v2108_v59 }
 0x2c1   : > { %v1751_v2 = vadd.f32 %v2182_v63, %v1681_v1 }
 0x2db   : > { %v2215_v3 = vpop.f32.mrb[6].mxu0 }
 0x2dc   : > { %v2250_v4 = vpop.f32.mrb[6].mxu1  ;;  %v2216_v5 = vpop.f32.mrb[7].mxu0 }
 0x2dd   : > { %v2217_v6 = vadd.f32 %v2216_v5, %v2215_v3  ;;  %v2251_v7 = vpop.f32.mrb[7].mxu1 }
 0x2de   : > { %v2252_v8 = vadd.f32 %v2251_v7, %v2250_v4 }
 0x2df   : > { %v1821_v9 = vadd.f32 %v2217_v6, %v1751_v2 }
 0x2e1   : > { %v1891_v12 = vadd.f32 %v2252_v8, %v1821_v9 }
 0x2e3   : > { %1894 = vst [vmem:[%s499_s30] sm:$0xff] %v1891_v12 }
 0x2e4   : > { %2794 = shalt.err (!%p2791_p2)
}
 0x2e5   : > { %s2795_s13 = scalar_lea.hbm %s3322_s5, 128  ;;  %s2799_s20 = scalar_lea.hbm %s3445_s21, 384 }
 0x2e6   : > { %p2796_p10 = scmp.ne.s32.totalorder %s3322_s5, %s2795_s13  ;;  %p2800_p6 = scmp.lt.u32.totalorder %s3322_s5, %s3445_s21 }
 0x2e7   : > { %p2801_p9 = scmp.lt.u32.totalorder %s2799_s20, %s2795_s13  ;;  %p2803_p12 = scmp.lt.u32.totalorder %s2795_s13, %s3322_s5 }
 0x2e8   : > { %p2797_p7 = pnand %p2796_p10, %p3446_p8 }
 0x2e9   : > { %p2802_p11 = por %p2801_p9, %p2800_p6 }
 0x2ea   : > { %p2798_p13 = pneg %p2797_p7 }
 0x2eb   : > { %p2804_p5 = por %p2803_p12, %p2802_p11 }
 0x2ed   : > { %p2805_p3 = pnand %p2804_p5, %p2798_p13 }
 0x2ef   : > { %2808 = shalt.err (!%p2805_p3)
}
 0x2f0   : > { %2467 = dma.vmem_to_hbm [thread:$0]  (%p3446_p8), %s3324_s8, 128, %s3322_s5, %s1896_s25  }
 0x2f1 PF: > { %s3447_s15 = sld [smem:[#allocation22_spill]]  ;;  %s3448_s28 = sld [smem:[#allocation20_spill]] }
 0x2f2   : > { %s3449_s23 = sld [smem:[#allocation26_spill]] }
 0x2f7   : > { %p2505_p0 = scmp.ge.s32.totalorder %s3447_s15, 2  ;;  %s1922_s18 = sand.u32 1, %s3448_s28  }
 0x2f8   : > { %p3450_p4 = scmp.ne.s32.totalorder %s3449_s23, 0  ;;  %s1923_s3 = scalar_lea.sflag [#allocation4], %s1922_s18 }
 0x2fa   : > { %p2493_p1 = pnand %p2505_p0, %p3450_p4 }
 0x2fc   : > { %2850 = dma.done.wait (!%p2493_p1), %s1923_s3, 128  }
 0x2fd   : > { %2852 = vsyncadd (!%p2493_p1), %s1923_s3, 4294967168  ;;  %s30_s14 = sadd.s32 1, %s3447_s15   ;;  %s3451_s17 = sld [smem:[#allocation25_spill]] }
 0x2fe   : > { %p27_p2 = scmp.ge.s32.totalorder %s30_s14, 5   ;;  %s3452_s12 = sld [smem:[#allocation21_spill]] }
 0x2ff   : > { %s3453_s13 = sld [smem:[#allocation23_spill]]  ;;  %s3454_s30 = smov %s2859_s10 }
 0x300   : > { %s3455_s10 = smov %s2863_s11  ;;  %29 = sbr.rel (!%p27_p2) target bundleno = 16 (0x10), region = 141 }
 0x303   : > { %s3456_s11 = smov %s3451_s17 }
 0x307   :  { %1928 = vsyncpa [#allocation3], 1 }
 0x308   :  { %1930 = vsyncpa [#allocation3 + $0x1], 1 }
 0x309   :  { %1931 = vsyncpa [#allocation6], 1 }
 0x30a   :  { %1933 = vsyncpa [#allocation6 + $0x1], 1 }
 0x30b   :  { %1934 = vsyncpa [#allocation9], 1 }
 0x30c   :  { %1935 = vsyncpa [#allocation12], 1 }
 0x30d   :  { %1936 = vsyncpa [#allocation4], 1 }
 0x30e   :  { %1938 = vsyncpa [#allocation4 + $0x1], 1 }

</bundles_post_ra>
